<compile_context>
chip_gen: v6e
topology: v6e:2x2x1
jax: 0.10.0
libtpu: 0.0.40
codegen_flags: <defaults>
</compile_context>

<pallas_src>
import functools

import jax
import jax.numpy as jnp
from jax.experimental import pallas as pl
from jax.experimental.pallas import tpu as pltpu


def _vmem_spec():
    # Demo shapes are tiny -> keep whole arrays resident in VMEM, no grid.
    return pl.BlockSpec(memory_space=pltpu.MemorySpace.VMEM)


def _round_up(v, m):
    return ((v + m - 1) // m) * m


# ----------------------------- fused Pallas kernel -------------------------- #

def _cp_forward_kernel(a_ref, x_ref, p_ref, w_ref, b_ref, emb_ref, out_ref, *,
                       fin_pad, hidden, half, emb_dim, out_pad, offs):
    f32 = jnp.float32
    bf16 = jnp.bfloat16

    a = a_ref[...]                      # (Np, Np)      bf16 — DMA'd from HBM once
    x = x_ref[...]                      # (Np, fin_pad) bf16 (zero-padded cols)

    # Static slices into the packed weight / bias slabs (8-aligned row offsets,
    # zero runtime cost for the views; padded rows/cols are zeros).
    o1, o2, o3, o4, o5 = offs
    w1    = w_ref[o1:o1 + fin_pad, 0:hidden]     # (fin_pad, H)   bf16
    w2    = w_ref[o2:o2 + hidden,  0:hidden]     # (H, H)         bf16
    fc1_w = w_ref[o3:o3 + hidden,  0:half]       # (H, H//2)      bf16
    fce_w = w_ref[o4:o4 + half,    0:emb_dim]    # (H//2, E)      bf16
    fco_w = w_ref[o5:o5 + emb_dim, 0:out_pad]    # (E, out_pad)   bf16

    b1    = b_ref[0:1, 0:hidden]                 # f32 biases
    b2    = b_ref[1:2, 0:hidden]
    fc1_b = b_ref[2:3, 0:half]
    fce_b = b_ref[3:4, 0:emb_dim]
    fco_b = b_ref[4:5, 0:out_pad]

    # ---- GCN layer 1: h = relu(A_hat @ (X @ W1) + b1) ----------------------
    # X@W1 is a single near-free MXU pass (K = fin_pad <= 8).
    xw = jnp.dot(x, w1, preferred_element_type=f32)
    h = jnp.dot(a, xw.astype(bf16), preferred_element_type=f32)   # K = Np >= 128
    h = jnp.maximum(h + b1, 0.0)                  # bias + ReLU in f32
    # dropout -> identity (inference)

    # ---- GCN layer 2: h2 = relu(A_hat @ (h @ W2) + b2) ----------------------
    hw = jnp.dot(h.astype(bf16), w2, preferred_element_type=f32)
    h2 = jnp.dot(a, hw.astype(bf16), preferred_element_type=f32)  # K = Np >= 128
    h2 = jnp.maximum(h2 + b2, 0.0)
    # dropout -> identity (inference)

    # ---- global_mean_pool (fused, f32 for exact means) ----------------------
    g = jnp.dot(p_ref[...], h2, preferred_element_type=f32)       # (Gp, H)

    # ---- MLP head ------------------------------------------------------------
    g = jnp.maximum(
        jnp.dot(g.astype(bf16), fc1_w, preferred_element_type=f32) + fc1_b, 0.0)
    # dropout -> identity (inference)
    emb = jnp.maximum(
        jnp.dot(g.astype(bf16), fce_w, preferred_element_type=f32) + fce_b, 0.0)
    emb_ref[...] = emb                            # (Gp, E): 8 sublanes, 128 lanes -> unmasked vst

    out_ref[...] = (
        jnp.dot(emb.astype(bf16), fco_w, preferred_element_type=f32) + fco_b)


# ------------------------------- JAX glue ----------------------------------- #

def normalized_adjacency(edge_index, num_nodes):
    """D^{-1/2} (A + I) D^{-1/2} as a dense (N, N) matrix (GCNConv semantics)."""
    src, dst = edge_index[0], edge_index[1]
    a = jnp.zeros((num_nodes, num_nodes), jnp.float32).at[src, dst].add(1.0)
    a = a + jnp.eye(num_nodes, dtype=jnp.float32)      # add self-loops
    deg = a.sum(axis=1)
    d_inv_sqrt = jax.lax.rsqrt(jnp.maximum(deg, 1e-12))
    return d_inv_sqrt[:, None] * a * d_inv_sqrt[None, :]


def pooling_matrix(batch, num_graphs):
    """P[g, i] = 1/|graph g| if node i belongs to graph g else 0."""
    onehot = (batch[None, :] == jnp.arange(num_graphs)[:, None]).astype(jnp.float32)
    counts = jnp.maximum(onehot.sum(axis=1, keepdims=True), 1.0)
    return onehot / counts


def init_params(key, input_dim, hidden_dim, emb_dim, output_dim):
    ks = jax.random.split(key, 8)

    def glorot(k, shape):
        lim = jnp.sqrt(6.0 / (shape[0] + shape[1]))
        return jax.random.uniform(k, shape, jnp.float32, -lim, lim)

    def unif(k, shape, fan_in):
        lim = 1.0 / jnp.sqrt(float(fan_in))
        return jax.random.uniform(k, shape, jnp.float32, -lim, lim)

    return {
        "conv1_w": glorot(ks[0], (input_dim, hidden_dim)),
        "conv1_b": jnp.zeros((hidden_dim,), jnp.float32),
        "conv2_w": glorot(ks[1], (hidden_dim, hidden_dim)),
        "conv2_b": jnp.zeros((hidden_dim,), jnp.float32),
        "fc1_w": glorot(ks[2], (hidden_dim, hidden_dim // 2)),
        "fc1_b": unif(ks[3], (hidden_dim // 2,), hidden_dim),
        "fc_emb_w": glorot(ks[4], (hidden_dim // 2, emb_dim)),
        "fc_emb_b": unif(ks[5], (emb_dim,), hidden_dim // 2),
        "fc_out_w": glorot(ks[6], (emb_dim, output_dim)),
        "fc_out_b": unif(ks[7], (output_dim,), emb_dim),
    }


def cp_model_forward(params, x, edge_index, batch, num_graphs):
    n, in_dim = x.shape
    hidden = params["conv1_w"].shape[1]
    half = params["fc1_w"].shape[1]
    emb_dim = params["fc_emb_w"].shape[1]
    out_dim = params["fc_out_w"].shape[1]

    bf16 = jnp.bfloat16

    # Padded layout constants (all static at trace time).
    # N padded to >=128 so the A_hat matmuls have an MXU-native contraction
    # width (use 256 multiples on v6e/v7x once N grows past 128).
    n_pad = _round_up(max(n, 128), 128)
    g_pad = _round_up(max(num_graphs, 8), 8)        # full sublanes -> unmasked vst
    fin_pad = _round_up(in_dim, 8)
    out_pad = _round_up(max(out_dim, 128), 128)     # lane-dense store width
    slab_w = _round_up(max(hidden, half, emb_dim, out_pad), 128)

    # Dense normalized adjacency (bf16, zero-padded: padded rows/cols never
    # touch real outputs) and dense pooling matrix (f32: exact means).
    # TODO(synk): CSR scalar-prefetch path replaces this densification at scale.
    a_hat = jnp.zeros((n_pad, n_pad), jnp.float32)
    a_hat = a_hat.at[:n, :n].set(normalized_adjacency(edge_index, n)).astype(bf16)

    x_p = jnp.zeros((n_pad, fin_pad), jnp.float32).at[:n, :in_dim].set(x).astype(bf16)

    p = jnp.zeros((g_pad, n_pad), jnp.float32)
    p = p.at[:num_graphs, :n].set(pooling_matrix(batch, num_graphs))

    # --- pack all weights into ONE bf16 slab (row-concat, 8-aligned offsets) ---
    row_sizes = [fin_pad, _round_up(hidden, 8), _round_up(hidden, 8),
                 _round_up(half, 8), _round_up(emb_dim, 8)]
    offs, acc = [], 0
    for r in row_sizes:
        offs.append(acc)
        acc += r
    slab_rows = acc

    w_slab = jnp.zeros((slab_rows, slab_w), jnp.float32)
    w_slab = w_slab.at[offs[0]:offs[0] + in_dim, :hidden].set(params["conv1_w"])
    w_slab = w_slab.at[offs[1]:offs[1] + hidden, :hidden].set(params["conv2_w"])
    w_slab = w_slab.at[offs[2]:offs[2] + hidden, :half].set(params["fc1_w"])
    w_slab = w_slab.at[offs[3]:offs[3] + half, :emb_dim].set(params["fc_emb_w"])
    w_slab = w_slab.at[offs[4]:offs[4] + emb_dim, :out_dim].set(params["fc_out_w"])
    w_slab = w_slab.astype(bf16)

    # --- pack all biases into ONE f32 slab ------------------------------------
    b_slab = jnp.zeros((8, slab_w), jnp.float32)
    b_slab = b_slab.at[0, :hidden].set(params["conv1_b"])
    b_slab = b_slab.at[1, :hidden].set(params["conv2_b"])
    b_slab = b_slab.at[2, :half].set(params["fc1_b"])
    b_slab = b_slab.at[3, :emb_dim].set(params["fc_emb_b"])
    b_slab = b_slab.at[4, :out_dim].set(params["fc_out_b"])

    # Scoped-VMEM budget sized from the actual resident set (+ headroom for
    # in-kernel intermediates); kept well under every chip's physical VMEM.
    in_bytes = (a_hat.size * 2 + x_p.size * 2 + p.size * 4
                + w_slab.size * 2 + b_slab.size * 4)
    out_bytes = g_pad * emb_dim * 4 + g_pad * out_pad * 4
    inter_bytes = 4 * n_pad * max(hidden, slab_w) * 4   # xw/h/hw/h2 f32
    vmem_limit = min(64 << 20, max(8 << 20, 2 * (in_bytes + out_bytes + inter_bytes)))

    kernel = functools.partial(
        _cp_forward_kernel,
        fin_pad=fin_pad, hidden=hidden, half=half, emb_dim=emb_dim,
        out_pad=out_pad, offs=tuple(offs))

    emb, out_padded = pl.pallas_call(
        kernel,
        out_shape=(
            jax.ShapeDtypeStruct((g_pad, emb_dim), jnp.float32),
            jax.ShapeDtypeStruct((g_pad, out_pad), jnp.float32),
        ),
        in_specs=[_vmem_spec()] * 5,
        out_specs=(_vmem_spec(), _vmem_spec()),
        compiler_params=pltpu.CompilerParams(vmem_limit_bytes=int(vmem_limit)),
    )(a_hat, x_p, p, w_slab, b_slab)

    return emb[:num_graphs], out_padded[:num_graphs, :out_dim]


# --------------------------------- main -------------------------------------- #

if __name__ == "__main__":
    key = jax.random.PRNGKey(0)
    k_x, k_p = jax.random.split(key)

    NUM_GRAPHS = 4
    NODES_PER_GRAPH = 16
    NUM_NODES = NUM_GRAPHS * NODES_PER_GRAPH     # 64
    INPUT_DIM = 4
    HIDDEN_DIM = 128                             # model defaults (lane-dense)
    EMB_DIM = 128
    OUTPUT_DIM = 1

    # node features
    x = jax.random.normal(k_x, (NUM_NODES, INPUT_DIM), jnp.float32)

    # deterministic undirected ring within each graph
    srcs, dsts = [], []
    for gidx in range(NUM_GRAPHS):
        base = gidx * NODES_PER_GRAPH
        for i in range(NODES_PER_GRAPH):
            u = base + i
            v = base + (i + 1) % NODES_PER_GRAPH
            srcs += [u, v]
            dsts += [v, u]
    edge_index = jnp.array([srcs, dsts], dtype=jnp.int32)

    batch = jnp.array(
        [g for g in range(NUM_GRAPHS) for _ in range(NODES_PER_GRAPH)],
        dtype=jnp.int32)

    params = init_params(k_p, INPUT_DIM, HIDDEN_DIM, EMB_DIM, OUTPUT_DIM)

    fwd = jax.jit(cp_model_forward, static_argnums=(4,))
    emb, out = fwd(params, x, edge_index, batch, NUM_GRAPHS)
    jax.block_until_ready((emb, out))

    assert emb.shape == (NUM_GRAPHS, EMB_DIM)
    assert out.shape == (NUM_GRAPHS, OUTPUT_DIM)
    assert bool(jnp.all(jnp.isfinite(emb))) and bool(jnp.all(jnp.isfinite(out)))
    print("KERNEL_OK")
</pallas_src>

<mosaic_0001>
module attributes {stable_mosaic.version = 11 : i64} {
  func.func private @main(%arg0: i32) attributes {dimension_semantics = [#tpu.dimension_semantics<core_parallel>], iteration_bounds = array<i64: 2>, tpu.core_type = #tpu.core_type<sc_scalar_subcore>, window_params = []} {
    return
  }
}

module attributes {stable_mosaic.version = 11 : i64} {
  func.func private @main(%arg0: i32) attributes {dimension_semantics = [#tpu.dimension_semantics<core_parallel>], iteration_bounds = array<i64: 2>, tpu.core_type = #tpu.core_type<sc_scalar_subcore>, window_params = []} {
    return
  }
}

module attributes {stable_mosaic.version = 11 : i64} {
  func.func @_cp_forward_kernel(%arg0: memref<128x128xbf16, #tpu.memory_space<vmem>>, %arg1: memref<128x8xbf16, #tpu.memory_space<vmem>>, %arg2: memref<8x128xf32, #tpu.memory_space<vmem>>, %arg3: memref<456x128xbf16, #tpu.memory_space<vmem>>, %arg4: memref<8x128xf32, #tpu.memory_space<vmem>>, %arg5: memref<8x128xf32, #tpu.memory_space<vmem>>, %arg6: memref<8x128xf32, #tpu.memory_space<vmem>>) attributes {dimension_semantics = [], scalar_prefetch = 0 : i64, scratch_operands = 0 : i64, tpu.core_type = #tpu.core_type<tc>} {
    %c0 = arith.constant 0 : index
    %c0_0 = arith.constant 0 : index
    %0 = vector.load %arg0[%c0, %c0_0] : memref<128x128xbf16, #tpu.memory_space<vmem>>, vector<128x128xbf16>
    %c0_1 = arith.constant 0 : index
    %c0_2 = arith.constant 0 : index
    %1 = vector.load %arg1[%c0_1, %c0_2] : memref<128x8xbf16, #tpu.memory_space<vmem>>, vector<128x8xbf16>
    %c0_3 = arith.constant 0 : index
    %c0_4 = arith.constant 0 : index
    %2 = vector.load %arg3[%c0_3, %c0_4] : memref<456x128xbf16, #tpu.memory_space<vmem>>, vector<8x128xbf16>
    %c8 = arith.constant 8 : index
    %c0_5 = arith.constant 0 : index
    %3 = vector.load %arg3[%c8, %c0_5] : memref<456x128xbf16, #tpu.memory_space<vmem>>, vector<128x128xbf16>
    %c136 = arith.constant 136 : index
    %c0_6 = arith.constant 0 : index
    %4 = vector.load %arg3[%c136, %c0_6] : memref<456x128xbf16, #tpu.memory_space<vmem>>, vector<128x64xbf16>
    %c264 = arith.constant 264 : index
    %c0_7 = arith.constant 0 : index
    %5 = vector.load %arg3[%c264, %c0_7] : memref<456x128xbf16, #tpu.memory_space<vmem>>, vector<64x128xbf16>
    %c328 = arith.constant 328 : index
    %c0_8 = arith.constant 0 : index
    %6 = vector.load %arg3[%c328, %c0_8] : memref<456x128xbf16, #tpu.memory_space<vmem>>, vector<128x128xbf16>
    %c0_9 = arith.constant 0 : index
    %c0_10 = arith.constant 0 : index
    %7 = vector.load %arg4[%c0_9, %c0_10] : memref<8x128xf32, #tpu.memory_space<vmem>>, vector<1x128xf32>
    %c1 = arith.constant 1 : index
    %c0_11 = arith.constant 0 : index
    %8 = vector.load %arg4[%c1, %c0_11] : memref<8x128xf32, #tpu.memory_space<vmem>>, vector<1x128xf32>
    %c2 = arith.constant 2 : index
    %c0_12 = arith.constant 0 : index
    %9 = vector.load %arg4[%c2, %c0_12] : memref<8x128xf32, #tpu.memory_space<vmem>>, vector<1x64xf32>
    %c3 = arith.constant 3 : index
    %c0_13 = arith.constant 0 : index
    %10 = vector.load %arg4[%c3, %c0_13] : memref<8x128xf32, #tpu.memory_space<vmem>>, vector<1x128xf32>
    %c4 = arith.constant 4 : index
    %c0_14 = arith.constant 0 : index
    %11 = vector.load %arg4[%c4, %c0_14] : memref<8x128xf32, #tpu.memory_space<vmem>>, vector<1x128xf32>
    %cst = arith.constant dense<0.000000e+00> : vector<128x128xf32>
    %12 = tpu.matmul %1, %2, %cst {dimension_numbers = #tpu.dot_dimension_numbers<[1], [0], [0], [1], [0, 0, 1, 1], [], []>} : vector<128x8xbf16>, vector<8x128xbf16>, vector<128x128xf32> -> vector<128x128xf32>
    %13 = arith.truncf %12 : vector<128x128xf32> to vector<128x128xbf16>
    %cst_15 = arith.constant dense<0.000000e+00> : vector<128x128xf32>
    %14 = tpu.matmul %0, %13, %cst_15 {dimension_numbers = #tpu.dot_dimension_numbers<[1], [0], [0], [1], [0, 0, 1, 1], [], []>} : vector<128x128xbf16>, vector<128x128xbf16>, vector<128x128xf32> -> vector<128x128xf32>
    %15 = vector.broadcast %7 : vector<1x128xf32> to vector<128x128xf32>
    %16 = arith.addf %14, %15 : vector<128x128xf32>
    %cst_16 = arith.constant 0.000000e+00 : f32
    %17 = vector.broadcast %cst_16 : f32 to vector<128x128xf32>
    %18 = arith.maximumf %16, %17 : vector<128x128xf32>
    %19 = arith.truncf %18 : vector<128x128xf32> to vector<128x128xbf16>
    %cst_17 = arith.constant dense<0.000000e+00> : vector<128x128xf32>
    %20 = tpu.matmul %19, %3, %cst_17 {dimension_numbers = #tpu.dot_dimension_numbers<[1], [0], [0], [1], [0, 0, 1, 1], [], []>} : vector<128x128xbf16>, vector<128x128xbf16>, vector<128x128xf32> -> vector<128x128xf32>
    %21 = arith.truncf %20 : vector<128x128xf32> to vector<128x128xbf16>
    %cst_18 = arith.constant dense<0.000000e+00> : vector<128x128xf32>
    %22 = tpu.matmul %0, %21, %cst_18 {dimension_numbers = #tpu.dot_dimension_numbers<[1], [0], [0], [1], [0, 0, 1, 1], [], []>} : vector<128x128xbf16>, vector<128x128xbf16>, vector<128x128xf32> -> vector<128x128xf32>
    %23 = vector.broadcast %8 : vector<1x128xf32> to vector<128x128xf32>
    %24 = arith.addf %22, %23 : vector<128x128xf32>
    %cst_19 = arith.constant 0.000000e+00 : f32
    %25 = vector.broadcast %cst_19 : f32 to vector<128x128xf32>
    %26 = arith.maximumf %24, %25 : vector<128x128xf32>
    %c0_20 = arith.constant 0 : index
    %c0_21 = arith.constant 0 : index
    %27 = vector.load %arg2[%c0_20, %c0_21] : memref<8x128xf32, #tpu.memory_space<vmem>>, vector<8x128xf32>
    %cst_22 = arith.constant dense<0.000000e+00> : vector<8x128xf32>
    %28 = tpu.matmul %27, %26, %cst_22 {dimension_numbers = #tpu.dot_dimension_numbers<[1], [0], [0], [1], [0, 0, 1, 1], [], []>} : vector<8x128xf32>, vector<128x128xf32>, vector<8x128xf32> -> vector<8x128xf32>
    %29 = arith.truncf %28 : vector<8x128xf32> to vector<8x128xbf16>
    %cst_23 = arith.constant dense<0.000000e+00> : vector<8x64xf32>
    %30 = tpu.matmul %29, %4, %cst_23 {dimension_numbers = #tpu.dot_dimension_numbers<[1], [0], [0], [1], [0, 0, 1, 1], [], []>} : vector<8x128xbf16>, vector<128x64xbf16>, vector<8x64xf32> -> vector<8x64xf32>
    %31 = vector.broadcast %9 : vector<1x64xf32> to vector<8x64xf32>
    %32 = arith.addf %30, %31 : vector<8x64xf32>
    %cst_24 = arith.constant 0.000000e+00 : f32
    %33 = vector.broadcast %cst_24 : f32 to vector<8x64xf32>
    %34 = arith.maximumf %32, %33 : vector<8x64xf32>
    %35 = arith.truncf %34 : vector<8x64xf32> to vector<8x64xbf16>
    %cst_25 = arith.constant dense<0.000000e+00> : vector<8x128xf32>
    %36 = tpu.matmul %35, %5, %cst_25 {dimension_numbers = #tpu.dot_dimension_numbers<[1], [0], [0], [1], [0, 0, 1, 1], [], []>} : vector<8x64xbf16>, vector<64x128xbf16>, vector<8x128xf32> -> vector<8x128xf32>
    %37 = vector.broadcast %10 : vector<1x128xf32> to vector<8x128xf32>
    %38 = arith.addf %36, %37 : vector<8x128xf32>
    %cst_26 = arith.constant 0.000000e+00 : f32
    %39 = vector.broadcast %cst_26 : f32 to vector<8x128xf32>
    %40 = arith.maximumf %38, %39 : vector<8x128xf32>
    %c0_27 = arith.constant 0 : index
    %c0_28 = arith.constant 0 : index
    %41 = vector.load %arg5[%c0_27, %c0_28] : memref<8x128xf32, #tpu.memory_space<vmem>>, vector<8x128xf32>
    tpu.vector_store %arg5[%c0_27, %c0_28], %40 {strides = array<i32>} : memref<8x128xf32, #tpu.memory_space<vmem>>, vector<8x128xf32>,
    %42 = arith.truncf %40 : vector<8x128xf32> to vector<8x128xbf16>
    %cst_29 = arith.constant dense<0.000000e+00> : vector<8x128xf32>
    %43 = tpu.matmul %42, %6, %cst_29 {dimension_numbers = #tpu.dot_dimension_numbers<[1], [0], [0], [1], [0, 0, 1, 1], [], []>} : vector<8x128xbf16>, vector<128x128xbf16>, vector<8x128xf32> -> vector<8x128xf32>
    %44 = vector.broadcast %11 : vector<1x128xf32> to vector<8x128xf32>
    %45 = arith.addf %43, %44 : vector<8x128xf32>
    %c0_30 = arith.constant 0 : index
    %c0_31 = arith.constant 0 : index
    %46 = vector.load %arg6[%c0_30, %c0_31] : memref<8x128xf32, #tpu.memory_space<vmem>>, vector<8x128xf32>
    tpu.vector_store %arg6[%c0_30, %c0_31], %45 {strides = array<i32>} : memref<8x128xf32, #tpu.memory_space<vmem>>, vector<8x128xf32>,
    return
  }
}

</mosaic_0001>

<bundles_post_ra>
// kernel: cp_model_forward.1
= control target key start
LH: loop header
LB: loop body
LE: loop exit
PB: predicated region body
PF: predicated region fallthrough
CT: control target
= control target key end

     0   :  { %vm182_vm0 = vcmask 1043456   ;;  %vm157_vm1 = vcmask 64512   ;;  %vm1480_vm2 = vmmov 0   ;;  %vm928_vm3 = vcmask 523264   ;;  %s1765_s3 = inlined_call_operand.vmem [shape: bf16[456,128], index: 3, kind: input, shape index: {}]   ;;  %s1766_s1 = inlined_call_operand.vmem [shape: bf16[128,8], index: 1, kind: input, shape index: {}]   ;;  %s1767_s0 = inlined_call_operand.vmem [shape: bf16[128,128], index: 0, kind: input, shape index: {}]   ;;  %s1768_s4 = inlined_call_operand.vmem [shape: f32[8,128], index: 4, kind: input, shape index: {}]   ;;  %s1769_s2 = inlined_call_operand.vmem [shape: f32[8,128], index: 2, kind: input, shape index: {}]   ;;  %s1770_s5 = inlined_call_operand.vmem [shape: f32[8,128], index: 5, kind: output, shape index: {0}]   ;;  %s1771_s6 = inlined_call_operand.vmem [shape: f32[8,128], index: 6, kind: output, shape index: {1}]  }
   0x1   :  { %v55_v0 = vld [vmem:[%s1765_s3] sm:$0xf]  ;;  %v1436_v3 = vld [vmem:[%s1766_s1 + $0x8] sm:$0xff]   ;;  %v1437_v4 = vld [vmem:[%s1766_s1 + $0x10] sm:$0xff]  }
   0x2   :  { %1432 = vmatprep.subr.msk.bf16.mxu1 %vm182_vm0, %v55_v0  ;;  %v184_v1 = vsel %vm182_vm0, %v55_v0, 0  ;;  %v1435_v2 = vld [vmem:[%s1766_s1] sm:$0xff]   ;;  %v1438_v5 = vld [vmem:[%s1766_s1 + $0x18] sm:$0xff]   ;;  %v1440_v7 = vld [vmem:[%s1766_s1 + $0x28] sm:$0xff]  }
   0x3   :  { %1232 = vmatpush3.bf16.msra.mxu1 %v184_v1  ;;  %1233 = vmatprep.mubr.msk.bf16.mxu1 %vm157_vm1, %v1435_v2  ;;  %v1439_v6 = vld [vmem:[%s1766_s1 + $0x20] sm:$0xff]   ;;  %v1441_v8 = vld [vmem:[%s1766_s1 + $0x30] sm:$0xff]   ;;  %v1442_v9 = vld [vmem:[%s1766_s1 + $0x38] sm:$0xff]  }
   0x4   :  { %v1554_v10 = vld [vmem:[%s1767_s0] sm:$0xff]   ;;  %v1452_v12 = vld [vmem:[%s1765_s3 + $0x34] sm:$0xff]   ;;  %v1453_v13 = vld [vmem:[%s1765_s3 + $0x2c] sm:$0xff]  }
   0x5   :  { %v1451_v11 = vld [vmem:[%s1765_s3 + $0x3c] sm:$0xff]   ;;  %v1454_v14 = vld [vmem:[%s1765_s3 + $0x24] sm:$0xff]   ;;  %v1580_v41 = vld [vmem:[%s1767_s0 + $0x10] sm:$0xff]  }
   0x6   :  { %1234 = vmatmul.mubr.msk.bf16.vlgmr.msra.gmra.mxu1 %vm157_vm1, %v1436_v3  ;;  %1281 = vmatprep.subr.bf16.mxu0 %v1451_v11  ;;  %v1455_v15 = vld [vmem:[%s1765_s3 + $0x1c] sm:$0xff]   ;;  %v1575_v40 = vld [vmem:[%s1767_s0 + $0x8] sm:$0xff]   ;;  %v1604_v45 = vld [vmem:[%s1767_s0 + $0x30] sm:$0xff]  }
   0x7   :  { %1237 = vmatprep.mubr.msk.bf16.mxu1 %vm157_vm1, %v1437_v4  ;;  %1282 = vmatpush3.bf16.msra.mxu0 %v1451_v11  ;;  %v1587_v42 = vld [vmem:[%s1767_s0 + $0x18] sm:$0xff]   ;;  %v1592_v43 = vld [vmem:[%s1767_s0 + $0x20] sm:$0xff]   ;;  %v1599_v44 = vld [vmem:[%s1767_s0 + $0x28] sm:$0xff]  }
   0x8   :  { %1283 = vmatprep.subr.bf16.mxu0 %v1452_v12  ;;  %v1611_v46 = vld [vmem:[%s1767_s0 + $0x38] sm:$0xff]   ;;  %v1457_v48 = vld [vmem:[%s1765_s3 + $0xc] sm:$0xff]   ;;  %v1458_v49 = vld [vmem:[%s1765_s3 + $0x4] sm:$0xff]  }
   0x9   :  { %v1456_v47 = vld [vmem:[%s1765_s3 + $0x14] sm:$0xff]   ;;  %v1092_v52 = vld [vmem:[%s1768_s4] ss:$0 sm:$0xff] }
   0xb   :  { %1284 = vmatpush3.bf16.msra.mxu0 %v1452_v12 }
   0xc   :  { %1285 = vmatprep.subr.bf16.mxu0 %v1453_v13 }
   0xe   :  { %1238 = vmatmul.mubr.msk.bf16.gmra.mxu1 %vm157_vm1, %v1438_v5 }
   0xf   :  { %1241 = vmatprep.mubr.msk.bf16.mxu1 %vm157_vm1, %v1439_v6  ;;  %1286 = vmatpush3.bf16.msra.mxu0 %v1453_v13 }
  0x10   :  { %1287 = vmatprep.subr.bf16.mxu0 %v1454_v14 }
  0x13   :  { %1288 = vmatpush3.bf16.msra.mxu0 %v1454_v14 }
  0x14   :  { %1289 = vmatprep.subr.bf16.mxu0 %v1455_v15 }
  0x16   :  { %1242 = vmatmul.mubr.msk.bf16.gmra.mxu1 %vm157_vm1, %v1440_v7 }
  0x17   :  { %1245 = vmatprep.mubr.msk.bf16.mxu1 %vm157_vm1, %v1441_v8  ;;  %1290 = vmatpush3.bf16.msra.mxu0 %v1455_v15 }
  0x18   :  { %1291 = vmatprep.subr.bf16.mxu0 %v1456_v47 }
  0x1b   :  { %1292 = vmatpush3.bf16.msra.mxu0 %v1456_v47 }
  0x1c   :  { %1293 = vmatprep.subr.bf16.mxu0 %v1457_v48 }
  0x1e   :  { %1246 = vmatmul.mubr.msk.bf16.gmra.mxu1 %vm157_vm1, %v1442_v9 }
  0x1f   :  { %1265 = vmatprep.mubr.bf16.mxu1 %v1554_v10  ;;  %1294 = vmatpush3.bf16.msra.mxu0 %v1457_v48 }
  0x20   :  { %1295 = vmatprep.subr.bf16.mxu0 %v1458_v49 }
  0x23   :  { %1296 = vmatpush3.bf16.msra.mxu0 %v1458_v49 }
  0xc6   :  { %v1235_v16 = vpop.f32.mrf.mxu1 }
  0xc8   :  { %v220_v17 = vpop.f32.mrf.mxu1 }
  0xca   :  { %v1236_v18 = vpop.f32.mrf.mxu1 }
  0xcb   :  { %v284_v38 = vpack.c.bf16 %v1236_v18, %v1235_v16 }
  0xcc   :  { %v223_v19 = vpop.f32.mrf.mxu1 }
  0xcd   :  { %v283_v39 = vpack.c.bf16 %v223_v19, %v220_v17 }
  0xce   :  { %v1239_v20 = vpop.f32.mrf.mxu1 }
  0xd0   :  { %v236_v21 = vpop.f32.mrf.mxu1 }
  0xd2   :  { %v1240_v22 = vpop.f32.mrf.mxu1 }
  0xd3   :  { %v286_v36 = vpack.c.bf16 %v1240_v22, %v1239_v20 }
  0xd4   :  { %v239_v23 = vpop.f32.mrf.mxu1 }
  0xd5   :  { %v285_v37 = vpack.c.bf16 %v239_v23, %v236_v21 }
  0xd6   :  { %v1243_v24 = vpop.f32.mrf.mxu1 }
  0xd8   :  { %v252_v25 = vpop.f32.mrf.mxu1 }
  0xda   :  { %v1244_v26 = vpop.f32.mrf.mxu1 }
  0xdb   :  { %v288_v34 = vpack.c.bf16 %v1244_v26, %v1243_v24 }
  0xdc   :  { %v255_v27 = vpop.f32.mrf.mxu1 }
  0xdd   :  { %v287_v35 = vpack.c.bf16 %v255_v27, %v252_v25 }
  0xde   :  { %v1247_v28 = vpop.f32.mrf.mxu1 }
  0xe0   :  { %v268_v29 = vpop.f32.mrf.mxu1 }
  0xe2   :  { %v1248_v30 = vpop.f32.mrf.mxu1 }
  0xe3   :  { %v290_v31 = vpack.c.bf16 %v1248_v30, %v1247_v28 }
  0xe4   :  { %v271_v32 = vpop.f32.mrf.mxu1 }
  0xe5   :  { %v289_v33 = vpack.c.bf16 %v271_v32, %v268_v29  ;;  %1249 = vmatprep.subr.bf16.mxu1 %v290_v31 }
  0xe6   :  { %1250 = vmatpush3.bf16.msra.mxu1 %v290_v31 }
  0xe7   :  { %1251 = vmatprep.subr.bf16.mxu1 %v289_v33 }
  0xea   :  { %1252 = vmatpush3.bf16.msra.mxu1 %v289_v33 }
  0xeb   :  { %1253 = vmatprep.subr.bf16.mxu1 %v288_v34 }
  0xee   :  { %1254 = vmatpush3.bf16.msra.mxu1 %v288_v34 }
  0xef   :  { %1255 = vmatprep.subr.bf16.mxu1 %v287_v35 }
  0xf2   :  { %1256 = vmatpush3.bf16.msra.mxu1 %v287_v35 }
  0xf3   :  { %1257 = vmatprep.subr.bf16.mxu1 %v286_v36 }
  0xf6   :  { %1258 = vmatpush3.bf16.msra.mxu1 %v286_v36 }
  0xf7   :  { %1259 = vmatprep.subr.bf16.mxu1 %v285_v37 }
  0xfa   :  { %1260 = vmatpush3.bf16.msra.mxu1 %v285_v37 }
  0xfb   :  { %1261 = vmatprep.subr.bf16.mxu1 %v284_v38 }
  0xfe   :  { %1262 = vmatpush3.bf16.msra.mxu1 %v284_v38 }
  0xff   :  { %1263 = vmatprep.subr.bf16.mxu1 %v283_v39 }
 0x102   :  { %1264 = vmatpush3.bf16.msra.mxu1 %v283_v39 }
 0x105   :  { %1266 = vmatmul.mubr.bf16.vlgmr.msra.gmra.mxu1 %v1575_v40 }
 0x106   :  { %1269 = vmatprep.mubr.bf16.mxu1 %v1580_v41 }
 0x10d   :  { %1270 = vmatmul.mubr.bf16.gmra.mxu1 %v1587_v42 }
 0x10e   :  { %1273 = vmatprep.mubr.bf16.mxu1 %v1592_v43 }
 0x115   :  { %1274 = vmatmul.mubr.bf16.gmra.mxu1 %v1599_v44 }
 0x116   :  { %1277 = vmatprep.mubr.bf16.mxu1 %v1604_v45 }
 0x11d   :  { %1278 = vmatmul.mubr.bf16.gmra.mxu1 %v1611_v46 }
 0x11e   :  { %1329 = vmatprep.mubr.bf16.mxu1 %v1554_v10 }
 0x1c5   :  { %v1267_v50 = vpop.f32.mrf.mxu1 }
 0x1c6   :  { %v386_v56 = vadd.f32 %v1267_v50, %v1092_v52 }
 0x1c7   :  { %v377_v51 = vpop.f32.mrf.mxu1 }
 0x1c8   :  { %v378_v54 = vadd.f32 %v1092_v52, %v377_v51  ;;  %v442_v63 = vmax.f32 %v386_v56, 0.0 }
 0x1c9   :  { %v1268_v53 = vpop.f32.mrf.mxu1 }
 0x1ca   :  { %v389_v55 = vadd.f32 %v1268_v53, %v1092_v52  ;;  %v440_v61 = vmax.f32 %v378_v54, 0.0 }
 0x1cb   :  { %v380_v57 = vpop.f32.mrf.mxu1 }
 0x1cc   :  { %v381_v58 = vadd.f32 %v1092_v52, %v380_v57  ;;  %v443_v59 = vmax.f32 %v389_v55, 0.0 }
 0x1cd   :  { %v1271_v60 = vpop.f32.mrf.mxu1 }
 0x1ce   :  { %v441_v62 = vmax.f32 %v381_v58, 0.0  ;;  %v457_v2 = vpack.c.bf16 %v443_v59, %v442_v63  ;;  %v402_v6 = vadd.f32 %v1271_v60, %v1092_v52 }
 0x1cf   :  { %v393_v0 = vpop.f32.mrf.mxu1 }
 0x1d0   :  { %v456_v1 = vpack.c.bf16 %v441_v62, %v440_v61  ;;  %v394_v4 = vadd.f32 %v1092_v52, %v393_v0  ;;  %v446_v13 = vmax.f32 %v402_v6, 0.0 }
 0x1d1   :  { %v1272_v3 = vpop.f32.mrf.mxu1 }
 0x1d2   :  { %v405_v5 = vadd.f32 %v1272_v3, %v1092_v52  ;;  %1297 = vmatprep.mubr.bf16.mxu0 %v456_v1  ;;  %v444_v11 = vmax.f32 %v394_v4, 0.0 }
 0x1d3   :  { %v396_v7 = vpop.f32.mrf.mxu1  ;;  %1298 = vmatmul.mubr.bf16.vlgmr.msra.gmra.mxu0 %v457_v2 }
 0x1d4   :  { %v397_v8 = vadd.f32 %v1092_v52, %v396_v7  ;;  %v447_v9 = vmax.f32 %v405_v5, 0.0 }
 0x1d5   :  { %v1275_v10 = vpop.f32.mrf.mxu1 }
 0x1d6   :  { %v445_v12 = vmax.f32 %v397_v8, 0.0  ;;  %v459_v16 = vpack.c.bf16 %v447_v9, %v446_v13  ;;  %v418_v20 = vadd.f32 %v1275_v10, %v1092_v52  ;;  %v1479_v10 = vmov 0.0  }
 0x1d7   :  { %v409_v14 = vpop.f32.mrf.mxu1  ;;  %1345 = vmatprep.subr.mxu0 %v1479_v10 }
 0x1d8   :  { %v458_v15 = vpack.c.bf16 %v445_v12, %v444_v11  ;;  %v410_v18 = vadd.f32 %v1092_v52, %v409_v14  ;;  %v450_v27 = vmax.f32 %v418_v20, 0.0 }
 0x1d9   :  { %v1276_v17 = vpop.f32.mrf.mxu1 }
 0x1da   :  { %v421_v19 = vadd.f32 %v1276_v17, %v1092_v52  ;;  %1301 = vmatprep.mubr.bf16.mxu0 %v458_v15  ;;  %v448_v25 = vmax.f32 %v410_v18, 0.0 }
 0x1db   :  { %v412_v21 = vpop.f32.mrf.mxu1  ;;  %1302 = vmatmul.mubr.bf16.gmra.mxu0 %v459_v16 }
 0x1dc   :  { %v413_v22 = vadd.f32 %v1092_v52, %v412_v21  ;;  %v451_v23 = vmax.f32 %v421_v19, 0.0 }
 0x1dd   :  { %v1279_v24 = vpop.f32.mrf.mxu1 }
 0x1de   :  { %v449_v26 = vmax.f32 %v413_v22, 0.0  ;;  %v461_v30 = vpack.c.bf16 %v451_v23, %v450_v27  ;;  %v434_v34 = vadd.f32 %v1279_v24, %v1092_v52 }
 0x1df   :  { %v425_v28 = vpop.f32.mrf.mxu1 }
 0x1e0   :  { %v460_v29 = vpack.c.bf16 %v449_v26, %v448_v25  ;;  %v426_v32 = vadd.f32 %v1092_v52, %v425_v28  ;;  %v454_v47 = vmax.f32 %v434_v34, 0.0  ;;  %v1109_v25 = vld [vmem:[%s1768_s4 + $0x1] ss:$0 sm:$0xff] }
 0x1e1   :  { %v1280_v31 = vpop.f32.mrf.mxu1 }
 0x1e2   :  { %v437_v33 = vadd.f32 %v1280_v31, %v1092_v52  ;;  %1305 = vmatprep.mubr.bf16.mxu0 %v460_v29  ;;  %v452_v38 = vmax.f32 %v426_v32, 0.0 }
 0x1e3   :  { %v428_v35 = vpop.f32.mrf.mxu1  ;;  %1306 = vmatmul.mubr.bf16.gmra.mxu0 %v461_v30 }
 0x1e4   :  { %v429_v36 = vadd.f32 %v1092_v52, %v428_v35  ;;  %v455_v37 = vmax.f32 %v437_v33, 0.0 }
 0x1e6   :  { %v453_v39 = vmax.f32 %v429_v36, 0.0  ;;  %v463_v49 = vpack.c.bf16 %v455_v37, %v454_v47 }
 0x1e8   :  { %v462_v48 = vpack.c.bf16 %v453_v39, %v452_v38 }
 0x1ea   :  { %1309 = vmatprep.mubr.bf16.mxu0 %v462_v48 }
 0x1eb   :  { %1310 = vmatmul.mubr.bf16.gmra.mxu0 %v463_v49 }
 0x1ec   :  { %1377 = vmatprep.mubr.msk.f32.mxu0 %vm1480_vm2, %v1479_v10 }
 0x293   :  { %v1299_v50 = vpop.f32.mrf.mxu0 }
 0x295   :  { %v546_v51 = vpop.f32.mrf.mxu0 }
 0x297   :  { %v1300_v53 = vpop.f32.mrf.mxu0 }
 0x298   :  { %v610_v8 = vpack.c.bf16 %v1300_v53, %v1299_v50 }
 0x299   :  { %v549_v54 = vpop.f32.mrf.mxu0 }
 0x29a   :  { %v609_v9 = vpack.c.bf16 %v549_v54, %v546_v51 }
 0x29b   :  { %v1303_v55 = vpop.f32.mrf.mxu0 }
 0x29d   :  { %v562_v56 = vpop.f32.mrf.mxu0 }
 0x29f   :  { %v1304_v57 = vpop.f32.mrf.mxu0 }
 0x2a0   :  { %v612_v6 = vpack.c.bf16 %v1304_v57, %v1303_v55 }
 0x2a1   :  { %v565_v58 = vpop.f32.mrf.mxu0 }
 0x2a2   :  { %v611_v7 = vpack.c.bf16 %v565_v58, %v562_v56 }
 0x2a3   :  { %v1307_v59 = vpop.f32.mrf.mxu0 }
 0x2a5   :  { %v578_v60 = vpop.f32.mrf.mxu0 }
 0x2a7   :  { %v1308_v61 = vpop.f32.mrf.mxu0 }
 0x2a8   :  { %v614_v4 = vpack.c.bf16 %v1308_v61, %v1307_v59 }
 0x2a9   :  { %v581_v52 = vpop.f32.mrf.mxu0 }
 0x2aa   :  { %v613_v5 = vpack.c.bf16 %v581_v52, %v578_v60 }
 0x2ab   :  { %v1311_v62 = vpop.f32.mrf.mxu0 }
 0x2ad   :  { %v594_v63 = vpop.f32.mrf.mxu0 }
 0x2af   :  { %v1312_v0 = vpop.f32.mrf.mxu0 }
 0x2b0   :  { %v616_v1 = vpack.c.bf16 %v1312_v0, %v1311_v62 }
 0x2b1   :  { %v597_v2 = vpop.f32.mrf.mxu0 }
 0x2b2   :  { %v615_v3 = vpack.c.bf16 %v597_v2, %v594_v63  ;;  %1313 = vmatprep.subr.bf16.mxu1 %v616_v1 }
 0x2b3   :  { %1314 = vmatpush3.bf16.msra.mxu1 %v616_v1 }
 0x2b4   :  { %1315 = vmatprep.subr.bf16.mxu1 %v615_v3 }
 0x2b7   :  { %1316 = vmatpush3.bf16.msra.mxu1 %v615_v3  ;;  %v734_v3 = vld [vmem:[%s1769_s2] sm:$0xff] }
 0x2b8   :  { %1317 = vmatprep.subr.bf16.mxu1 %v614_v4 }
 0x2bb   :  { %1318 = vmatpush3.bf16.msra.mxu1 %v614_v4  ;;  %v1466_v4 = vld [vmem:[%s1765_s3 + $0x44] sm:$0xff]  }
 0x2bc   :  { %1319 = vmatprep.subr.bf16.mxu1 %v613_v5 }
 0x2bf   :  { %1320 = vmatpush3.bf16.msra.mxu1 %v613_v5  ;;  %v1467_v5 = vld [vmem:[%s1765_s3 + $0x9c] sm:$0xff]  }
 0x2c0   :  { %1321 = vmatprep.subr.bf16.mxu1 %v612_v6 }
 0x2c3   :  { %1322 = vmatpush3.bf16.msra.mxu1 %v612_v6  ;;  %v1468_v6 = vld [vmem:[%s1765_s3 + $0x94] sm:$0xff]  }
 0x2c4   :  { %1323 = vmatprep.subr.bf16.mxu1 %v611_v7 }
 0x2c7   :  { %1324 = vmatpush3.bf16.msra.mxu1 %v611_v7 }
 0x2c8   :  { %1325 = vmatprep.subr.bf16.mxu1 %v610_v8 }
 0x2cb   :  { %1326 = vmatpush3.bf16.msra.mxu1 %v610_v8 }
 0x2cc   :  { %1327 = vmatprep.subr.bf16.mxu1 %v609_v9 }
 0x2cf   :  { %1328 = vmatpush3.bf16.msra.mxu1 %v609_v9 }
 0x2d0   :  { %1380 = vmatprep.subr.bf16.mxu1 %v1479_v10 }
 0x2d2   :  { %1330 = vmatmul.mubr.bf16.vlgmr.msra.gmra.mxu1 %v1575_v40  ;;  %v1459_v40 = vld [vmem:[%s1765_s3 + $0x7c] sm:$0xff]  }
 0x2d3   :  { %1333 = vmatprep.mubr.bf16.mxu1 %v1580_v41  ;;  %1381 = vmatpush3.bf16.msra.mxu1 %v1459_v40  ;;  %v1460_v41 = vld [vmem:[%s1765_s3 + $0x74] sm:$0xff]   ;;  %v1469_v40 = vld [vmem:[%s1765_s3 + $0x8c] sm:$0xff]  }
 0x2d4   :  { %1382 = vmatprep.subr.bf16.mxu1 %v1479_v10 }
 0x2d7   :  { %1383 = vmatpush3.bf16.msra.mxu1 %v1460_v41  ;;  %v1470_v41 = vld [vmem:[%s1765_s3 + $0x84] sm:$0xff]  }
 0x2d8   :  { %1384 = vmatprep.subr.bf16.mxu1 %v1479_v10 }
 0x2da   :  { %1334 = vmatmul.mubr.bf16.gmra.mxu1 %v1587_v42  ;;  %v1461_v42 = vld [vmem:[%s1765_s3 + $0x6c] sm:$0xff]  }
 0x2db   :  { %1337 = vmatprep.mubr.bf16.mxu1 %v1592_v43  ;;  %1385 = vmatpush3.bf16.msra.mxu1 %v1461_v42  ;;  %v1462_v43 = vld [vmem:[%s1765_s3 + $0x64] sm:$0xff]   ;;  %v1110_v42 = vld [vmem:[%s1768_s4 + $0x2] ss:$0 sm:$0xff] }
 0x2dc   :  { %1386 = vmatprep.subr.bf16.mxu1 %v1479_v10 }
 0x2df   :  { %1387 = vmatpush3.bf16.msra.mxu1 %v1462_v43 }
 0x2e0   :  { %1388 = vmatprep.subr.bf16.mxu1 %v1479_v10 }
 0x2e2   :  { %1338 = vmatmul.mubr.bf16.gmra.mxu1 %v1599_v44  ;;  %v1463_v44 = vld [vmem:[%s1765_s3 + $0x5c] sm:$0xff]  }
 0x2e3   :  { %1341 = vmatprep.mubr.bf16.mxu1 %v1604_v45  ;;  %1389 = vmatpush3.bf16.msra.mxu1 %v1463_v44  ;;  %v1464_v45 = vld [vmem:[%s1765_s3 + $0x54] sm:$0xff]  }
 0x2e4   :  { %1390 = vmatprep.subr.bf16.mxu1 %v1479_v10 }
 0x2e7   :  { %1391 = vmatpush3.bf16.msra.mxu1 %v1464_v45 }
 0x2e8   :  { %1392 = vmatprep.subr.bf16.mxu1 %v1479_v10 }
 0x2ea   :  { %1342 = vmatmul.mubr.bf16.gmra.mxu1 %v1611_v46  ;;  %v1465_v46 = vld [vmem:[%s1765_s3 + $0x4c] sm:$0xff]  }
 0x2eb   :  { %1396 = vmatprep.mubr.msk.bf16.mxu1 %vm1480_vm2, %v1479_v10  ;;  %1393 = vmatpush3.bf16.msra.mxu1 %v1465_v46 }
 0x2ec   :  { %1394 = vmatprep.subr.bf16.mxu1 %v1479_v10 }
 0x2ef   :  { %1395 = vmatpush3.bf16.msra.mxu1 %v1466_v4 }
 0x392   :  { %v1331_v11 = vpop.f32.mrf.mxu1 }
 0x393   :  { %v664_v60 = vadd.f32 %v1331_v11, %v1109_v25 }
 0x394   :  { %v1668_v12 = vpop.f32.mrf.mxu1 }
 0x395   :  { %v720_v63 = vmax.f32 %v664_v60, 0.0  ;;  %v656_v0 = vadd.f32 %v1109_v25, %v1668_v12  ;;  %v1471_v12 = vld [vmem:[%s1765_s3 + $0xdc] sm:$0xff]  }
 0x396   :  { %v1332_v13 = vpop.f32.mrf.mxu1 }
 0x397   :  { %v667_v58 = vadd.f32 %v1332_v13, %v1109_v25  ;;  %v718_v2 = vmax.f32 %v656_v0, 0.0 }
 0x398   :  { %v1670_v14 = vpop.f32.mrf.mxu1 }
 0x399   :  { %v721_v52 = vmax.f32 %v667_v58, 0.0  ;;  %v659_v62 = vadd.f32 %v1109_v25, %v1670_v14 }
 0x39a   :  { %v1335_v15 = vpop.f32.mrf.mxu1 }
 0x39b   :  { %v680_v51 = vadd.f32 %v1335_v15, %v1109_v25  ;;  %v719_v1 = vmax.f32 %v659_v62, 0.0  ;;  %v1472_v15 = vld [vmem:[%s1765_s3 + $0xd4] sm:$0xff]  }
 0x39c   :  { %v671_v16 = vpop.f32.mrf.mxu1 }
 0x39d   :  { %v724_v56 = vmax.f32 %v680_v51, 0.0  ;;  %v672_v57 = vadd.f32 %v1109_v25, %v671_v16  ;;  %v1473_v16 = vld [vmem:[%s1765_s3 + $0xcc] sm:$0xff]  }
 0x39e   :  { %v1336_v17 = vpop.f32.mrf.mxu1 }
 0x39f   :  { %v683_v49 = vadd.f32 %v1336_v17, %v1109_v25  ;;  %v722_v61 = vmax.f32 %v672_v57, 0.0  ;;  %v1474_v17 = vld [vmem:[%s1765_s3 + $0xc4] sm:$0xff]  }
 0x3a0   :  { %v674_v18 = vpop.f32.mrf.mxu1 }
 0x3a1   :  { %v725_v54 = vmax.f32 %v683_v49, 0.0  ;;  %v675_v55 = vadd.f32 %v1109_v25, %v674_v18  ;;  %v1475_v18 = vld [vmem:[%s1765_s3 + $0xbc] sm:$0xff]  }
 0x3a2   :  { %v1339_v19 = vpop.f32.mrf.mxu1 }
 0x3a3   :  { %v696_v36 = vadd.f32 %v1339_v19, %v1109_v25  ;;  %v723_v59 = vmax.f32 %v675_v55, 0.0  ;;  %v1476_v19 = vld [vmem:[%s1765_s3 + $0xb4] sm:$0xff]  }
 0x3a4   :  { %v687_v20 = vpop.f32.mrf.mxu1 }
 0x3a5   :  { %v728_v47 = vmax.f32 %v696_v36, 0.0  ;;  %v688_v48 = vadd.f32 %v1109_v25, %v687_v20  ;;  %v1477_v20 = vld [vmem:[%s1765_s3 + $0xac] sm:$0xff]  }
 0x3a6   :  { %v1340_v21 = vpop.f32.mrf.mxu1 }
 0x3a7   :  { %v699_v34 = vadd.f32 %v1340_v21, %v1109_v25  ;;  %v726_v53 = vmax.f32 %v688_v48, 0.0  ;;  %v1478_v21 = vld [vmem:[%s1765_s3 + $0xa4] sm:$0xff]  }
 0x3a8   :  { %v690_v22 = vpop.f32.mrf.mxu1 }
 0x3a9   :  { %v729_v38 = vmax.f32 %v699_v34, 0.0  ;;  %v691_v39 = vadd.f32 %v1109_v25, %v690_v22  ;;  %v1119_v22 = vld [vmem:[%s1768_s4 + $0x3] ss:$0 sm:$0xff] }
 0x3aa   :  { %v1343_v23 = vpop.f32.mrf.mxu1 }
 0x3ab   :  { %v712_v27 = vadd.f32 %v1343_v23, %v1109_v25  ;;  %v727_v50 = vmax.f32 %v691_v39, 0.0 }
 0x3ac   :  { %v703_v24 = vpop.f32.mrf.mxu1 }
 0x3ad   :  { %v732_v32 = vmax.f32 %v712_v27, 0.0  ;;  %v704_v33 = vadd.f32 %v1109_v25, %v703_v24 }
 0x3ae   :  { %v1344_v26 = vpop.f32.mrf.mxu1 }
 0x3af   :  { %v715_v28 = vadd.f32 %v1344_v26, %v1109_v25  ;;  %v730_v37 = vmax.f32 %v704_v33, 0.0 }
 0x3b0   :  { %v706_v29 = vpop.f32.mrf.mxu1 }
 0x3b1   :  { %v733_v30 = vmax.f32 %v715_v28, 0.0  ;;  %v707_v31 = vadd.f32 %v1109_v25, %v706_v29  ;;  %v1125_v29 = vld [vmem:[%s1768_s4 + $0x4] ss:$0 sm:$0xff] }
 0x3b3   :  { %1346 = vmatpush3.msra.mxu0 %v733_v30  ;;  %v731_v35 = vmax.f32 %v707_v31, 0.0 }
 0x3b4   :  { %1347 = vmatprep.subr.mxu0 %v1479_v10 }
 0x3b5   :  { %1348 = vmatpush3.msra.mxu0 %v732_v32 }
 0x3b6   :  { %1349 = vmatprep.subr.mxu0 %v1479_v10 }
 0x3b7   :  { %1350 = vmatpush3.msra.mxu0 %v731_v35 }
 0x3b8   :  { %1351 = vmatprep.subr.mxu0 %v1479_v10 }
 0x3b9   :  { %1352 = vmatpush3.msra.mxu0 %v730_v37 }
 0x3ba   :  { %1353 = vmatprep.subr.mxu0 %v1479_v10 }
 0x3bb   :  { %1354 = vmatpush3.msra.mxu0 %v729_v38 }
 0x3bc   :  { %1355 = vmatprep.subr.mxu0 %v1479_v10 }
 0x3bd   :  { %1356 = vmatpush3.msra.mxu0 %v728_v47 }
 0x3be   :  { %1357 = vmatprep.subr.mxu0 %v1479_v10 }
 0x3bf   :  { %1358 = vmatpush3.msra.mxu0 %v727_v50 }
 0x3c0   :  { %1359 = vmatprep.subr.mxu0 %v1479_v10 }
 0x3c1   :  { %1360 = vmatpush3.msra.mxu0 %v726_v53 }
 0x3c2   :  { %1361 = vmatprep.subr.mxu0 %v1479_v10 }
 0x3c3   :  { %1362 = vmatpush3.msra.mxu0 %v725_v54 }
 0x3c4   :  { %1363 = vmatprep.subr.mxu0 %v1479_v10 }
 0x3c5   :  { %1364 = vmatpush3.msra.mxu0 %v724_v56 }
 0x3c6   :  { %1365 = vmatprep.subr.mxu0 %v1479_v10 }
 0x3c7   :  { %1366 = vmatpush3.msra.mxu0 %v723_v59 }
 0x3c8   :  { %1367 = vmatprep.subr.mxu0 %v1479_v10 }
 0x3c9   :  { %1368 = vmatpush3.msra.mxu0 %v722_v61 }
 0x3ca   :  { %1369 = vmatprep.subr.mxu0 %v1479_v10 }
 0x3cb   :  { %1370 = vmatpush3.msra.mxu0 %v721_v52 }
 0x3cc   :  { %1371 = vmatprep.subr.mxu0 %v1479_v10 }
 0x3cd   :  { %1372 = vmatpush3.msra.mxu0 %v720_v63 }
 0x3ce   :  { %1373 = vmatprep.subr.mxu0 %v1479_v10 }
 0x3cf   :  { %1374 = vmatpush3.msra.mxu0 %v719_v1 }
 0x3d0   :  { %1375 = vmatprep.subr.mxu0 %v1479_v10 }
 0x3d1   :  { %1376 = vmatpush3.msra.mxu0 %v718_v2 }
 0x3d2   :  { %1378 = vmatmul.mubr.f32.vlgmr.msra.gmra.mxu0 %v734_v3  ;;  %1400 = vmatprep.subr.bf16.mxu0 %v1479_v10 }
 0x3d3   :  { %1408 = vmatprep.mubr.msk.bf16.mxu0 %vm1480_vm2, %v1479_v10  ;;  %1401 = vmatpush3.bf16.msra.mxu0 %v1467_v5 }
 0x3d4   :  { %1402 = vmatprep.subr.bf16.mxu0 %v1479_v10 }
 0x3d7   :  { %1403 = vmatpush3.bf16.msra.mxu0 %v1468_v6 }
 0x3d8   :  { %1404 = vmatprep.subr.bf16.mxu0 %v1479_v10 }
 0x3db   :  { %1405 = vmatpush3.bf16.msra.mxu0 %v1469_v40 }
 0x3dc   :  { %1406 = vmatprep.subr.bf16.mxu0 %v1479_v10 }
 0x3df   :  { %1407 = vmatpush3.bf16.msra.mxu0 %v1470_v41 }
 0x3e0   :  { %1412 = vmatprep.subr.bf16.mxu0 %v1479_v10 }
 0x492   :  { %v801_v7 = vpop.f32.mrf.mxu0 }
 0x493   :  { %v805_v8 = vpack.c.bf16 %v801_v7, %v801_v7 }
 0x494   :  { %v1379_v9 = vpop.f32.mrf.mxu0 }
 0x495   :  { %1397 = vmatmul.mubr.bf16.vlgmr.msra.gmra.mxu1 %v805_v8 }
 0x555   :  { %v892_v43 = vpop.f32.mrf.mxu1 }
 0x556   :  { %v893_v44 = vadd.f32 %v1110_v42, %v892_v43 }
 0x557   :  { %v1398_v45 = vpop.f32.mrf.mxu1 }
 0x558   :  { %v898_v46 = vmax.f32 %v893_v44, 0.0 }
 0x559   :  { %v895_v11 = vpop.f32.mrf.mxu1 }
 0x55a   :  { %v899_v13 = vpack.c.bf16 %v898_v46, %v898_v46 }
 0x55b   :  { %v1399_v14 = vpop.f32.mrf.mxu1 }
 0x55c   :  { %1409 = vmatmul.mubr.msk.bf16.vlgmr.msra.gmra.mxu0 %vm928_vm3, %v899_v13 }
 0x55d   :  { %1413 = vmatpush3.bf16.msra.mxu0 %v1471_v12  ;;  %1428 = vmatprep.mubr.msk.bf16.mxu0 %vm1480_vm2, %v1479_v10 }
 0x55e   :  { %1414 = vmatprep.subr.bf16.mxu0 %v1479_v10 }
 0x561   :  { %1415 = vmatpush3.bf16.msra.mxu0 %v1472_v15 }
 0x562   :  { %1416 = vmatprep.subr.bf16.mxu0 %v1479_v10 }
 0x565   :  { %1417 = vmatpush3.bf16.msra.mxu0 %v1473_v16 }
 0x566   :  { %1418 = vmatprep.subr.bf16.mxu0 %v1479_v10 }
 0x569   :  { %1419 = vmatpush3.bf16.msra.mxu0 %v1474_v17 }
 0x56a   :  { %1420 = vmatprep.subr.bf16.mxu0 %v1479_v10 }
 0x56d   :  { %1421 = vmatpush3.bf16.msra.mxu0 %v1475_v18 }
 0x56e   :  { %1422 = vmatprep.subr.bf16.mxu0 %v1479_v10 }
 0x571   :  { %1423 = vmatpush3.bf16.msra.mxu0 %v1476_v19 }
 0x572   :  { %1424 = vmatprep.subr.bf16.mxu0 %v1479_v10 }
 0x575   :  { %1425 = vmatpush3.bf16.msra.mxu0 %v1477_v20 }
 0x576   :  { %1426 = vmatprep.subr.bf16.mxu0 %v1479_v10 }
 0x579   :  { %1427 = vmatpush3.bf16.msra.mxu0 %v1478_v21 }
 0x61c   :  { %v966_v23 = vpop.f32.mrf.mxu0 }
 0x61d   :  { %v967_v24 = vadd.f32 %v1119_v22, %v966_v23 }
 0x61e   :  { %v1410_v25 = vpop.f32.mrf.mxu0 }
 0x61f   :  { %v972_v26 = vmax.f32 %v967_v24, 0.0 }
 0x620   :  { %v969_v27 = vpop.f32.mrf.mxu0 }
 0x621   :  { %973 = vst [vmem:[%s1770_s5] sm:$0xff] %v972_v26  ;;  %v974_v28 = vpack.c.bf16 %v972_v26, %v972_v26 }
 0x622   :  { %v1411_v10 = vpop.f32.mrf.mxu0 }
 0x623   :  { %1429 = vmatmul.mubr.bf16.vlgmr.msra.gmra.mxu0 %v974_v28 }
 0x6e3   :  { %v1061_v30 = vpop.f32.mrf.mxu0 }
 0x6e4   :  { %v1062_v31 = vadd.f32 %v1125_v29, %v1061_v30 }
 0x6e5   :  { %v1430_v32 = vpop.f32.mrf.mxu0 }
 0x6e6   :  { %1067 = vst [vmem:[%s1771_s6] sm:$0xff] %v1062_v31 }
 0x6e7   :  { %v1064_v33 = vpop.f32.mrf.mxu0 }
 0x6e9   :  { %v1431_v34 = vpop.f32.mrf.mxu0 }

</bundles_post_ra>
